<compile_context>
chip_gen: v7x
topology: tpu7x:2x2x1
jax: 0.10.0
libtpu: 0.0.40
codegen_flags: <defaults>
</compile_context>

<pallas_src>
import functools

import jax
import jax.numpy as jnp
from jax.experimental import pallas as pl
from jax.experimental.pallas import tpu as pltpu


def _focal_loss_kernel(target_ref, x_ref, out_ref, sum_ref, cnt_ref,
                       *, gamma, ignore_index, n_rows, tile_n, steps_per_core):
    c = pl.program_id(0)          # core-split index ("parallel")
    i = pl.program_id(1)          # accumulation step ("arbitrary")

    @pl.when(i == 0)
    def _():
        sum_ref[...] = jnp.zeros_like(sum_ref)
        cnt_ref[...] = jnp.zeros_like(cnt_ref)

    # ---- row-wise log-sum-exp over the class axis (lanes) ----
    x = x_ref[...].astype(jnp.float32)                                # (TN, C)
    m = jnp.max(x, axis=1, keepdims=True)                             # (TN, 1)
    shifted = x - m
    lse = jnp.log(jnp.sum(jnp.exp(shifted), axis=1, keepdims=True))   # only full-C exp

    # ---- validity mask: ignore_index + ragged / clamped overflow blocks ----
    tgt = target_ref[...].astype(jnp.int32)                           # (TN, 1)
    row = jax.lax.broadcasted_iota(jnp.int32, tgt.shape, 0)
    blk = c * steps_per_core + i                                      # UNclamped logical block
    in_range = (blk * tile_n + row) < n_rows
    valid = (tgt != ignore_index) & in_range
    # TODO(synk): targets outside [0, C) that are != ignore_index are silently
    # treated as valid with a gathered logit of 0; PyTorch nll_loss would error.

    # ---- gather target column FIRST (one-hot select on raw shifted logits) ----
    col = jax.lax.broadcasted_iota(jnp.int32, x.shape, 1)             # (TN, C)
    onehot = (col == tgt) & valid
    shifted_t = jnp.sum(jnp.where(onehot, shifted, 0.0),
                        axis=1, keepdims=True)                        # (TN, 1)

    # ---- focal modulation on the gathered (TN, 1) column only ----
    logpt_t = shifted_t - lse
    pt_t = jnp.exp(logpt_t)                                           # 1 EUP op / row
    one_m = 1.0 - pt_t
    if float(gamma).is_integer() and 0 <= int(gamma) <= 8:
        g = int(gamma)
        w = jnp.ones_like(one_m) if g == 0 else one_m                 # no ones-seed multiply
        for _ in range(max(g - 1, 0)):                                # gamma=2 -> 1 VPU mul
            w = w * one_m
    else:
        # clamp: rounding can make pt marginally > 1 -> (1-pt) < 0 -> NaN under frac pow
        w = jnp.maximum(one_m, 0.0) ** jnp.float32(gamma)

    # jnp.where (not valid_f *) keeps garbage-row NaN/Inf out of the sum.
    contrib = jnp.where(valid, w * logpt_t, 0.0)

    # ---- per-step partial reduction into tiny scalar accumulators ----
    sum_ref[...] += jnp.sum(contrib)
    cnt_ref[...] += jnp.sum(valid.astype(jnp.float32))

    @pl.when(i == pl.num_programs(1) - 1)
    def _():
        r = jax.lax.broadcasted_iota(jnp.int32, out_ref.shape, 0)
        q = jax.lax.broadcasted_iota(jnp.int32, out_ref.shape, 1)
        out_ref[...] = jnp.where((r == 0) & (q == 0), sum_ref[...],
                                 jnp.where((r == 0) & (q == 1), cnt_ref[...], 0.0))


def focal_loss(x, target, *, gamma=2, ignore_index=-100, tile_n=None,
               num_splits=None):
    """x: [N, C] float (f32 or bf16), target: [N] int -> scalar float32 loss."""
    N, C = x.shape
    itemsize = jnp.dtype(x.dtype).itemsize
    c_pad = -(-C // 128) * 128                       # lane padding of the logits block

    try:
        vmem_cap = int(pltpu.get_tpu_info().vmem_capacity_bytes)
    except Exception:  # pragma: no cover - conservative fallback
        vmem_cap = 64 * 1024 * 1024

    # Scoped-VMEM target: well below physical (v7x has only 64 MiB per TC).
    vmem_limit_target = int(min(vmem_cap * 0.7, 48 * 1024 * 1024))

    if num_splits is None:
        # Leading "parallel" grid axis -> both TensorCores on v7x; on 1-TC chips
        # the two halves just run sequentially (negligible overhead).
        num_splits = 2 if N >= 16 else 1

    rows_per_core = pl.cdiv(N, num_splits)
    rows_per_core_pad = -(-rows_per_core // 8) * 8

    if tile_n is None:
        # Size tile by bytes: lane-padded logits row + 128-lane-padded int32 target row.
        per_row_vmem = c_pad * itemsize + 128 * 4
        avail = max(vmem_limit_target - (4 << 20), 1 << 20)
        t = (8 << 20) // per_row_vmem                 # ~8 MiB of input per buffer
        t = min(t, avail // (2 * per_row_vmem))       # double-buffered inputs must fit
        t = min(t, rows_per_core_pad)
        tile_n = max(8, (t // 8) * 8)

    assert tile_n % 8 == 0 or tile_n == N, "tile_n must be a multiple of 8"
    total_blocks = pl.cdiv(N, tile_n)
    steps_per_core = pl.cdiv(total_blocks, num_splits)
    last_block = total_blocks - 1

    target2d = target.reshape(N, 1).astype(jnp.int32)

    kernel = functools.partial(
        _focal_loss_kernel,
        gamma=float(gamma),
        ignore_index=int(ignore_index),
        n_rows=N,
        tile_n=tile_n,
        steps_per_core=steps_per_core,
    )

    def blk_map(ci, ii):
        # Clamp overflow blocks (num_splits*steps_per_core may exceed total_blocks)
        # so no DMA ever starts past the array end; those rows are masked in-kernel.
        return (jnp.minimum(ci * steps_per_core + ii, last_block), 0)

    # VMEM accounting with lane padding (target block pads 1 -> 128 lanes).
    need = (2 * tile_n * c_pad * itemsize            # logits double buffer
            + 2 * tile_n * 128 * 4                   # int32 target double buffer (padded)
            + num_splits * 8 * 128 * 4               # per-core output block
            + (2 << 20))                             # scratch + compiler headroom
    vmem_limit = int(min(max(need, 16 << 20), 48 << 20, int(vmem_cap * 0.85)))

    cost = pl.CostEstimate(
        flops=int(10 * N * C),
        transcendentals=int(N * C + 2 * N),
        bytes_accessed=int(N * C * itemsize + 4 * N + num_splits * 8 * 128 * 4),
    )

    out = pl.pallas_call(
        kernel,
        out_shape=jax.ShapeDtypeStruct((num_splits * 8, 128), jnp.float32),
        grid_spec=pltpu.PrefetchScalarGridSpec(
            num_scalar_prefetch=0,
            grid=(num_splits, steps_per_core),
            in_specs=[
                pl.BlockSpec((tile_n, 1), blk_map),   # target
                pl.BlockSpec((tile_n, C), blk_map),   # logits
            ],
            out_specs=pl.BlockSpec((8, 128), lambda ci, ii: (ci, 0)),
            scratch_shapes=[
                pltpu.VMEM((1, 1), jnp.float32),      # running focal-logpt sum
                pltpu.VMEM((1, 1), jnp.float32),      # running valid-row count
            ],
        ),
        compiler_params=pltpu.CompilerParams(
            dimension_semantics=("parallel", "arbitrary"),
            vmem_limit_bytes=vmem_limit),
        cost_estimate=cost,
    )(target2d, x)

    total = jnp.sum(out[:, 0])
    count = jnp.sum(out[:, 1])
    # nll_loss mean reduction: -sum / num_valid (NaN if no valid rows, as in torch).
    return -total / count


def _focal_loss_ref(x, target, gamma=2, ignore_index=-100):
    """Pure-JAX reference matching the PyTorch module."""
    logpt = jax.nn.log_softmax(x.astype(jnp.float32), axis=1)
    pt = jnp.exp(logpt)
    focal = ((1.0 - pt) ** gamma) * logpt
    valid = target != ignore_index
    safe_t = jnp.where(valid, target, 0)
    picked = jnp.take_along_axis(focal, safe_t[:, None], axis=1)[:, 0]
    picked = jnp.where(valid, picked, 0.0)
    return -jnp.sum(picked) / jnp.sum(valid.astype(jnp.float32))


if __name__ == "__main__":
    key = jax.random.PRNGKey(0)
    k1, k2, k3, k4, k5, k6 = jax.random.split(key, 6)

    # Test 1: multi-step accumulation + 2-way core split (explicit small tile).
    N1, C1 = 32, 32
    x1 = jax.random.normal(k1, (N1, C1), dtype=jnp.float32)
    t1 = jax.random.randint(k2, (N1,), 0, C1, dtype=jnp.int32)
    t1 = t1.at[3].set(-100).at[10].set(-100).at[25].set(-100)   # exercise ignore_index
    loss1 = jax.block_until_ready(focal_loss(x1, t1, gamma=2, tile_n=8))
    ref1 = _focal_loss_ref(x1, t1, gamma=2)
    assert jnp.allclose(loss1, ref1, atol=1e-5, rtol=1e-5), (loss1, ref1)

    # Test 2: auto tile size + ragged last tile (N not a multiple of 8).
    N2, C2 = 20, 32
    x2 = jax.random.normal(k3, (N2, C2), dtype=jnp.float32)
    t2 = jax.random.randint(k4, (N2,), 0, C2, dtype=jnp.int32)
    t2 = t2.at[0].set(-100)
    loss2 = jax.block_until_ready(focal_loss(x2, t2, gamma=2))
    ref2 = _focal_loss_ref(x2, t2, gamma=2)
    assert jnp.allclose(loss2, ref2, atol=1e-5, rtol=1e-5), (loss2, ref2)

    # Test 3: clamped overflow block (total blocks not divisible by num_splits).
    N3, C3 = 24, 16
    x3 = jax.random.normal(k5, (N3, C3), dtype=jnp.float32)
    t3 = jax.random.randint(k6, (N3,), 0, C3, dtype=jnp.int32)
    loss3 = jax.block_until_ready(focal_loss(x3, t3, gamma=2, tile_n=8))
    ref3 = _focal_loss_ref(x3, t3, gamma=2)
    assert jnp.allclose(loss3, ref3, atol=1e-5, rtol=1e-5), (loss3, ref3)

    # Test 4: bf16 logits stay bf16 in HBM (in-kernel f32 upcast), auto tile.
    x4 = x2.astype(jnp.bfloat16)
    loss4 = jax.block_until_ready(focal_loss(x4, t2, gamma=2))
    ref4 = _focal_loss_ref(x4, t2, gamma=2)
    assert jnp.allclose(loss4, ref4, atol=1e-4, rtol=1e-4), (loss4, ref4)

    print("KERNEL_OK")
</pallas_src>

<mosaic_0001>
module attributes {stable_mosaic.version = 11 : i64} {
  func.func @_focal_loss_kernel(%arg0: i32, %arg1: i32, %arg2: memref<8x1xi32, #tpu.memory_space<vmem>>, %arg3: memref<8x32xf32, #tpu.memory_space<vmem>>, %arg4: memref<8x128xf32, #tpu.memory_space<vmem>>, %arg5: memref<1x1xf32, #tpu.memory_space<vmem>>, %arg6: memref<1x1xf32, #tpu.memory_space<vmem>>) attributes {dimension_semantics = [#tpu.dimension_semantics<parallel>, #tpu.dimension_semantics<arbitrary>], iteration_bounds = array<i64: 2, 2>, scalar_prefetch = 0 : i64, scratch_operands = 2 : i64, tpu.core_type = #tpu.core_type<tc>, window_params = [{transform_indices = @transform_0, window_bounds = array<i64: 8, 1>}, {transform_indices = @transform_1, window_bounds = array<i64: 8, 32>}, {transform_indices = @transform_2, window_bounds = array<i64: 8, 128>}]} {
    %c0_i32 = arith.constant 0 : i32
    %0 = arith.cmpi eq, %arg1, %c0_i32 : i32
    %1 = arith.extui %0 : i1 to i32
    %c0_i32_0 = arith.constant 0 : i32
    %2 = arith.cmpi ne, %1, %c0_i32_0 : i32
    scf.if %2 {
      %cst_20 = arith.constant 0.000000e+00 : f32
      %62 = vector.broadcast %cst_20 : f32 to vector<1x1xf32>
      %c0_21 = arith.constant 0 : index
      %c0_22 = arith.constant 0 : index
      %63 = vector.load %arg5[%c0_21, %c0_22] : memref<1x1xf32, #tpu.memory_space<vmem>>, vector<1x1xf32>
      tpu.vector_store %arg5[%c0_21, %c0_22], %62 {strides = array<i32>} : memref<1x1xf32, #tpu.memory_space<vmem>>, vector<1x1xf32>,
      %cst_23 = arith.constant 0.000000e+00 : f32
      %64 = vector.broadcast %cst_23 : f32 to vector<1x1xf32>
      %c0_24 = arith.constant 0 : index
      %c0_25 = arith.constant 0 : index
      %65 = vector.load %arg6[%c0_24, %c0_25] : memref<1x1xf32, #tpu.memory_space<vmem>>, vector<1x1xf32>
      tpu.vector_store %arg6[%c0_24, %c0_25], %64 {strides = array<i32>} : memref<1x1xf32, #tpu.memory_space<vmem>>, vector<1x1xf32>,
    } else {
    }
    %c0 = arith.constant 0 : index
    %c0_1 = arith.constant 0 : index
    %3 = vector.load %arg3[%c0, %c0_1] : memref<8x32xf32, #tpu.memory_space<vmem>>, vector<8x32xf32>
    %cst = arith.constant dense<0xFF800000> : vector<8xf32>
    %4 = vector.multi_reduction <maximumf>, %3, %cst [1] : vector<8x32xf32> to vector<8xf32>
    %5 = vector.shape_cast %4 : vector<8xf32> to vector<8x1xf32>
    %6 = vector.broadcast %5 : vector<8x1xf32> to vector<8x32xf32>
    %7 = arith.subf %3, %6 : vector<8x32xf32>
    %8 = math.exp %7 : vector<8x32xf32>
    %cst_2 = arith.constant dense<0.000000e+00> : vector<8xf32>
    %9 = vector.multi_reduction <add>, %8, %cst_2 [1] : vector<8x32xf32> to vector<8xf32>
    %10 = vector.shape_cast %9 : vector<8xf32> to vector<8x1xf32>
    %11 = math.log %10 : vector<8x1xf32>
    %c0_3 = arith.constant 0 : index
    %c0_4 = arith.constant 0 : index
    %12 = vector.load %arg2[%c0_3, %c0_4] : memref<8x1xi32, #tpu.memory_space<vmem>>, vector<8x1xi32>
    %13 = tpu.iota {dimensions = array<i32: 0>} : vector<8x1xi32>
    %c2_i32 = arith.constant 2 : i32
    %14 = arith.muli %arg0, %c2_i32 : i32
    %15 = arith.addi %14, %arg1 : i32
    %c8_i32 = arith.constant 8 : i32
    %16 = arith.muli %15, %c8_i32 : i32
    %17 = vector.broadcast %16 : i32 to vector<8x1xi32>
    %18 = arith.addi %17, %13 : vector<8x1xi32>
    %c32_i32 = arith.constant 32 : i32
    %19 = vector.broadcast %c32_i32 : i32 to vector<8x1xi32>
    %20 = arith.cmpi slt, %18, %19 : vector<8x1xi32>
    %c-100_i32 = arith.constant -100 : i32
    %21 = vector.broadcast %c-100_i32 : i32 to vector<8x1xi32>
    %22 = arith.cmpi ne, %12, %21 : vector<8x1xi32>
    %23 = arith.andi %22, %20 : vector<8x1xi1>
    %24 = tpu.iota {dimensions = array<i32: 1>} : vector<8x32xi32>
    %25 = vector.broadcast %12 : vector<8x1xi32> to vector<8x32xi32>
    %26 = arith.cmpi eq, %24, %25 : vector<8x32xi32>
    %27 = vector.broadcast %23 : vector<8x1xi1> to vector<8x32xi1>
    %28 = arith.andi %26, %27 : vector<8x32xi1>
    %cst_5 = arith.constant 0.000000e+00 : f32
    %29 = vector.broadcast %cst_5 : f32 to vector<8x32xf32>
    %30 = arith.select %28, %7, %29 : vector<8x32xi1>, vector<8x32xf32>
    %cst_6 = arith.constant dense<0.000000e+00> : vector<8xf32>
    %31 = vector.multi_reduction <add>, %30, %cst_6 [1] : vector<8x32xf32> to vector<8xf32>
    %32 = vector.shape_cast %31 : vector<8xf32> to vector<8x1xf32>
    %33 = arith.subf %32, %11 : vector<8x1xf32>
    %34 = math.exp %33 : vector<8x1xf32>
    %cst_7 = arith.constant 1.000000e+00 : f32
    %35 = vector.broadcast %cst_7 : f32 to vector<8x1xf32>
    %36 = arith.subf %35, %34 : vector<8x1xf32>
    %37 = arith.mulf %36, %36 : vector<8x1xf32>
    %38 = arith.mulf %37, %33 : vector<8x1xf32>
    %cst_8 = arith.constant 0.000000e+00 : f32
    %39 = vector.broadcast %cst_8 : f32 to vector<8x1xf32>
    %40 = arith.select %23, %38, %39 : vector<8x1xi1>, vector<8x1xf32>
    %c0_9 = arith.constant 0 : index
    %c0_10 = arith.constant 0 : index
    %41 = vector.load %arg5[%c0_9, %c0_10] : memref<1x1xf32, #tpu.memory_space<vmem>>, vector<1x1xf32>
    %42 = vector.shape_cast %40 : vector<8x1xf32> to vector<1x8x1xf32>
    %cst_11 = arith.constant dense<0.000000e+00> : vector<1xf32>
    %43 = vector.multi_reduction <add>, %42, %cst_11 [1, 2] : vector<1x8x1xf32> to vector<1xf32>
    %44 = vector.shape_cast %43 : vector<1xf32> to vector<1x1x1xf32>
    %45 = vector.extract %44[0, 0, 0] : f32 from vector<1x1x1xf32>
    %46 = vector.broadcast %45 : f32 to vector<1x1xf32>
    %47 = arith.addf %41, %46 : vector<1x1xf32>
    %c0_12 = arith.constant 0 : index
    %c0_13 = arith.constant 0 : index
    %48 = vector.load %arg5[%c0_12, %c0_13] : memref<1x1xf32, #tpu.memory_space<vmem>>, vector<1x1xf32>
    tpu.vector_store %arg5[%c0_12, %c0_13], %47 {strides = array<i32>} : memref<1x1xf32, #tpu.memory_space<vmem>>, vector<1x1xf32>,
    %c0_14 = arith.constant 0 : index
    %c0_15 = arith.constant 0 : index
    %49 = vector.load %arg6[%c0_14, %c0_15] : memref<1x1xf32, #tpu.memory_space<vmem>>, vector<1x1xf32>
    %50 = arith.extui %23 : vector<8x1xi1> to vector<8x1xi32>
    %51 = arith.sitofp %50 : vector<8x1xi32> to vector<8x1xf32>
    %52 = vector.shape_cast %51 : vector<8x1xf32> to vector<1x8x1xf32>
    %cst_16 = arith.constant dense<0.000000e+00> : vector<1xf32>
    %53 = vector.multi_reduction <add>, %52, %cst_16 [1, 2] : vector<1x8x1xf32> to vector<1xf32>
    %54 = vector.shape_cast %53 : vector<1xf32> to vector<1x1x1xf32>
    %55 = vector.extract %54[0, 0, 0] : f32 from vector<1x1x1xf32>
    %56 = vector.broadcast %55 : f32 to vector<1x1xf32>
    %57 = arith.addf %49, %56 : vector<1x1xf32>
    %c0_17 = arith.constant 0 : index
    %c0_18 = arith.constant 0 : index
    %58 = vector.load %arg6[%c0_17, %c0_18] : memref<1x1xf32, #tpu.memory_space<vmem>>, vector<1x1xf32>
    tpu.vector_store %arg6[%c0_17, %c0_18], %57 {strides = array<i32>} : memref<1x1xf32, #tpu.memory_space<vmem>>, vector<1x1xf32>,
    %c1_i32 = arith.constant 1 : i32
    %59 = arith.cmpi eq, %arg1, %c1_i32 : i32
    %60 = arith.extui %59 : i1 to i32
    %c0_i32_19 = arith.constant 0 : i32
    %61 = arith.cmpi ne, %60, %c0_i32_19 : i32
    scf.if %61 {
      %62 = tpu.iota {dimensions = array<i32: 0>} : vector<8x128xi32>
      %63 = tpu.iota {dimensions = array<i32: 1>} : vector<8x128xi32>
      %c0_i32_20 = arith.constant 0 : i32
      %64 = vector.broadcast %c0_i32_20 : i32 to vector<8x128xi32>
      %65 = arith.cmpi eq, %62, %64 : vector<8x128xi32>
      %c0_i32_21 = arith.constant 0 : i32
      %66 = vector.broadcast %c0_i32_21 : i32 to vector<8x128xi32>
      %67 = arith.cmpi eq, %63, %66 : vector<8x128xi32>
      %68 = arith.andi %65, %67 : vector<8x128xi1>
      %c0_22 = arith.constant 0 : index
      %c0_23 = arith.constant 0 : index
      %69 = vector.load %arg5[%c0_22, %c0_23] : memref<1x1xf32, #tpu.memory_space<vmem>>, vector<1x1xf32>
      %c0_i32_24 = arith.constant 0 : i32
      %70 = vector.broadcast %c0_i32_24 : i32 to vector<8x128xi32>
      %71 = arith.cmpi eq, %62, %70 : vector<8x128xi32>
      %c1_i32_25 = arith.constant 1 : i32
      %72 = vector.broadcast %c1_i32_25 : i32 to vector<8x128xi32>
      %73 = arith.cmpi eq, %63, %72 : vector<8x128xi32>
      %74 = arith.andi %71, %73 : vector<8x128xi1>
      %c0_26 = arith.constant 0 : index
      %c0_27 = arith.constant 0 : index
      %75 = vector.load %arg6[%c0_26, %c0_27] : memref<1x1xf32, #tpu.memory_space<vmem>>, vector<1x1xf32>
      %cst_28 = arith.constant 0.000000e+00 : f32
      %76 = vector.shape_cast %75 : vector<1x1xf32> to vector<1x1xf32>
      %77 = vector.broadcast %76 : vector<1x1xf32> to vector<8x128xf32>
      %78 = vector.broadcast %cst_28 : f32 to vector<8x128xf32>
      %79 = arith.select %74, %77, %78 : vector<8x128xi1>, vector<8x128xf32>
      %80 = vector.shape_cast %69 : vector<1x1xf32> to vector<1x1xf32>
      %81 = vector.broadcast %80 : vector<1x1xf32> to vector<8x128xf32>
      %82 = arith.select %68, %81, %79 : vector<8x128xi1>, vector<8x128xf32>
      %c0_29 = arith.constant 0 : index
      %c0_30 = arith.constant 0 : index
      %83 = vector.load %arg4[%c0_29, %c0_30] : memref<8x128xf32, #tpu.memory_space<vmem>>, vector<8x128xf32>
      tpu.vector_store %arg4[%c0_29, %c0_30], %82 {strides = array<i32>} : memref<8x128xf32, #tpu.memory_space<vmem>>, vector<8x128xf32>,
    } else {
    }
    return
  }
  func.func @transform_0(%arg0: i32, %arg1: i32) -> (i32, i32) {
    %c2_i32 = arith.constant 2 : i32
    %0 = arith.muli %arg0, %c2_i32 : i32
    %1 = arith.addi %0, %arg1 : i32
    %c3_i32 = arith.constant 3 : i32
    %2 = arith.minsi %1, %c3_i32 : i32
    %c0_i32 = arith.constant 0 : i32
    %c0_i32_0 = arith.constant 0 : i32
    return %2, %c0_i32 : i32, i32
  }
  func.func @transform_1(%arg0: i32, %arg1: i32) -> (i32, i32) {
    %c2_i32 = arith.constant 2 : i32
    %0 = arith.muli %arg0, %c2_i32 : i32
    %1 = arith.addi %0, %arg1 : i32
    %c3_i32 = arith.constant 3 : i32
    %2 = arith.minsi %1, %c3_i32 : i32
    %c0_i32 = arith.constant 0 : i32
    %c0_i32_0 = arith.constant 0 : i32
    return %2, %c0_i32 : i32, i32
  }
  func.func @transform_2(%arg0: i32, %arg1: i32) -> (i32, i32) {
    %c0_i32 = arith.constant 0 : i32
    %c0_i32_0 = arith.constant 0 : i32
    return %arg0, %c0_i32 : i32, i32
  }
}

</mosaic_0001>

<bundles_post_ra>
// kernel: tpu_custom_call.1
= control target key start
LH: loop header
LB: loop body
LE: loop exit
PB: predicated region body
PF: predicated region fallthrough
CT: control target
= control target key end

     0   :  { %7 = vsyncpa [#allocation5], 0  ;;  %s838_s0 = inlined_call_operand.vmem [shape: s32[32,1], index: 0, kind: input, shape index: {}]   ;;  %s839_s1 = inlined_call_operand.vmem [shape: f32[32,32], index: 1, kind: input, shape index: {}]   ;;  %s840_s2 = inlined_call_operand.hbm [shape: f32[16,128], index: 2, kind: output, shape index: {}]  }
   0x1   :  { %9 = vsyncpa [#allocation5 + $0x1], 0  ;;  %s672_s9 = smov 0   ;;  %s674_s10 = smov 0  }
   0x2   :  { %s676_s11 = smov 0   ;;  %s678_s12 = smov 0  }
   0x3   :  { %s680_s13 = smov 0   ;;  %s682_s14 = smov 0  }
   0x4   :  { %s684_s15 = smov 0   ;;  %s686_s16 = smov 0  }
   0x5 LB: > { %s437_s17 = sadd.s32 4294967295, %s650_s16   ;;  %s438_s18 = sadd.s32 4294967294, %s650_s16   ;;  %s650_s16 = sphi %s686_s16, %s15_s16   ;;  %s646_s15 = sphi %s684_s15, %s851_s15   ;;  %s642_s14 = sphi %s682_s14, %s850_s14   ;;  %s638_s13 = sphi %s680_s13, %s849_s13   ;;  %s634_s12 = sphi %s678_s12, %s848_s12   ;;  %s630_s11 = sphi %s676_s11, %s847_s11   ;;  %s626_s10 = sphi %s674_s10, %s846_s10   ;;  %s622_s9 = sphi %s672_s9, %s845_s9  }
   0x6   : > { %s24_s19 = sadd.s32 1, %s642_s14  ;;  %s27_s20 = sadd.s32 1, %s646_s15 }
   0x7   : > { %p25_p0 = scmp.ge.s32.totalorder %s24_s19, 2  ;;  %p112_p1 = scmp.ne.s32.totalorder %s630_s11, %s626_s10 }
   0x8   : > { %p113_p2 = scmp.eq.s32.totalorder %s437_s17, 3  ;;  %p118_p4 = scmp.ne.s32.totalorder %s626_s10, %s622_s9 }
   0x9   : > { %s853_s19 = smov (%p25_p0, %s24_s19), 0  ;;  %s855_s20 = smov (!%p25_p0, %s27_s20), %s646_s15 }
   0xa   : > { %p721_p3 = por %p113_p2, %p112_p1  ;;  %p29_p5 = scmp.ge.s32.totalorder %s855_s20, 2 }
   0xb   : > { %p119_p6 = scmp.eq.s32.totalorder %s438_s18, 3  ;;  %p445_p7 = scmp.ge.s32.totalorder %s650_s16, 1 }
   0xc   : > { %p167_p8 = scmp.lt.s32.totalorder %s650_s16, 5  ;;  %s857_s20 = smov (%p29_p5, %s855_s20), 0 }
   0xd   : > { %p731_p9 = por %p119_p6, %p118_p4  ;;  %s99_s23 = ssub.s32 %s646_s15, %s857_s20 }
   0xe   : > { %p168_p10 = pnand %p445_p7, %p167_p8  ;;  %s102_s24 = sadd.s32 1, %s630_s11 }
   0xf   : > { %p100_p11 = scmp.eq.s32.totalorder %s99_s23, 0  ;;  %s197_s26 = sand.u32 (!%p168_p10), 1, %s626_s10  }
  0x10   : > { %171 = sbr.rel (%p168_p10) target bundleno = 743 (0x2e7), region = 28  ;;  %s447_s27 = sshll.u32 (!%p168_p10), %s638_s13, 1 }
  0x11   : > { %s739_s25 = scalar_select %p100_p11, %s630_s11, %s102_s24  }
  0x12   : > { %s745_s28 = sshll.u32 (!%p168_p10), %s197_s26, 3  ;;  %s201_s29 = sadd.s32 (!%p168_p10), %s634_s12, %s447_s27 }
  0x13   : > { %p202_p12 = scmp.lt.s32.totalorder (!%p168_p10), %s201_s29, 3  ;;  %s199_s18 = scalar_lea.vmem (!%p168_p10), [#allocation4], %s745_s28 }
  0x14   : > { %p457_p13 = scmp.ne.s32.totalorder (!%p168_p10), %s634_s12, 0 }
  0x17   : > { %s203_s30 = scalar_select %p202_p12, %s201_s29, 3 }
  0x18   : > { %227 = sbr.rel (%p457_p13) target bundleno = 31 (0x1f), region = 32  ;;  %vm228_vm0 = vcmask (!%p457_p13), 0   ;;  %v652_v0 = vmov (!%p457_p13), 0.0  }
  0x19   : > { %s859_s30 = smov (!%p202_p12, %s203_s30), 3  ;;  %229 = vst.msk [vmem:[#allocation2] sm:$0x1] (!%p457_p13), %vm228_vm0, %v652_v0  ;;  %230 = vst.msk [vmem:[#allocation3] sm:$0x1] (!%p457_p13), %vm228_vm0, %v652_v0 }
  0x1a   : > { %s451_s3 = sshll.u32 %s859_s30, 3 }
  0x1b   : > { %s207_s6 = scalar_lea.vmem %s838_s0, %s451_s3  ;;  %s219_s17 = scalar_lea.vmem %s839_s1, %s451_s3 }
  0x1f PF: > { %v231_v1 = vld [vmem:[%s219_s17] sm:$0xff]  ;;  %vm232_vm1 = vcmask 261120   ;;  %v245_v2 = vlaneseq  ;;  %s459_s23 = sshll.u32 %s201_s29, 3  ;;  %v653_v4 = vmov 0   ;;  %vm279_vm8 = vcmask 7168   ;;  %p461_p0 = scmp.ne.s32.totalorder %s634_s12, 1 }
  0x20   : > { %v233_v3 = vsel %vm232_vm1, %v231_v1, -inf  ;;  %548 = vset.pattern.permute.xlu1 %v653_v4  ;;  %547 = vset.pattern.permute.xlu0 %v653_v4  ;;  %v244_v5 = vld [vmem:[%s207_s6] sm:$0xff]  ;;  %v250_v6 = vstv %s459_s23  ;;  %v654_v21 = vmov 0.0   ;;  %vm292_vm9 = vcmask 0  }
  0x21   : > { %234 = vmax.xlane.f32.xlu0 %v233_v3  ;;  %v757_v7 = vshrl.u32 %v245_v2, 7  ;;  %vm253_vm2 = vcmp.ne.s32.totalorder %v244_v5, 4294967196  ;;  %v766_v14 = vand.u32 127, %v245_v2  ;;  %v278_v50 = vld [vmem:[#allocation2] sm:$0x1]  ;;  %v655_v57 = vmov (!%p461_p0), 0  }
  0x22   : > { %v294_v51 = vld [vmem:[#allocation3] sm:$0x1] }
  0x23   : > { %v251_v8 = vadd.s32 %v250_v6, %v757_v7  ;;  %vm313_vm10 = vcmp.eq.s32.totalorder (!%p461_p0), %v757_v7, 0  ;;  %vm317_vm11 = vcmp.eq.s32.totalorder (!%p461_p0), %v766_v14, 1  ;;  %vm314_vm12 = vcmp.eq.s32.totalorder (!%p461_p0), %v766_v14, 0 }
  0x24   : > { %vm318_vm13 = vmand (!%p461_p0), %vm313_vm10, %vm317_vm11 }
  0x25   : > { %vm252_vm3 = vcmp.lt.s32.totalorder %v251_v8, 32  ;;  %vm315_vm14 = vmand (!%p461_p0), %vm313_vm10, %vm314_vm12 }
  0x26   : > { %vm760_vm4 = vmand %vm253_vm2, %vm252_vm3 }
  0x27   : > { %v261_v10 = vsel %vm760_vm4, 1, %v653_v4  ;;  %v460_v22 = vsel %vm760_vm4, 1.0, %v654_v21 }
  0x28   : > { %263 = vperm.xlu1 %548, %v261_v10   ;;  %v296_v23 = vsel %vm279_vm8, %v460_v22, 0.0 }
  0x37   : > { %258 = vperm.xlu0 %547, %v244_v5  }
  0x3b   : > { %555 = vset.pattern.permute.xlu0 (!%p461_p0), %v655_v57 }
  0x56   : > { %297 = vadd.xlane.f32.xlu0 %v296_v23 }
  0xa7   : > { %v264_v15 = vpop.permute.xlu1 %263 }
  0xa8   : > { %vm265_vm5 = vcmp.eq.s32.totalorder %v264_v15, 1 }
  0xae   : > { %v235_v11 = vpop.xlane.xlu0 %234 }
  0xaf   : > { %v236_v12 = vsub.f32 %v231_v1, %v235_v11 }
  0xb1   : > { %v237_v13 = vmul.f32 1.442695, %v236_v12 }
  0xb3   : > { %549 = vpow2.f32 %v237_v13 }
  0xb6   : > { %v259_v16 = vpop.permute.xlu0 %258 }
  0xb7   : > { %vm260_vm6 = vcmp.eq.s32.totalorder %v766_v14, %v259_v16 }
  0xb8   : > { %vm266_vm7 = vmand %vm260_vm6, %vm265_vm5 }
  0xb9   : > { %v267_v19 = vsel %vm266_vm7, %v236_v12, 0.0 }
  0xba   : > { %v268_v20 = vsel %vm232_vm1, %v267_v19, 0.0 }
  0xbd   : > { %v550_v17 = vpop.eup %549 }
  0xbe   : > { %v239_v18 = vsel %vm232_vm1, %v550_v17, 0.0 }
  0xbf   : > { %240 = vadd.xlane.f32.xlu1 %v239_v18 }
  0xc3   : > { %269 = vadd.xlane.f32.xlu1 %v268_v20 }
  0xe3   : > { %v298_v36 = vpop.xlane.xlu0 %297 }
  0xe4   : > { %v299_v37 = vrot.slane %v298_v36, 4 }
  0xe6   : > { %v300_v38 = vadd.f32 %v299_v37, %v298_v36 }
  0xe8   : > { %v301_v39 = vrot.slane %v300_v38, 2 }
  0xea   : > { %v302_v43 = vadd.f32 %v301_v39, %v300_v38 }
  0xec   : > { %v303_v46 = vrot.slane %v302_v43, 1 }
  0xee   : > { %v304_v49 = vadd.f32 %v303_v46, %v302_v43 }
 0x14c   : > { %v241_v24 = vpop.xlane.xlu1 %240 }
 0x14d   : > { %551 = vlog2.f32 %v241_v24 }
 0x150   : > { %v270_v27 = vpop.xlane.xlu1 %269 }
 0x157   : > { %v552_v25 = vpop.eup %551 }
 0x158   : > { %v243_v26 = vmul.f32 0.6931472, %v552_v25 }
 0x15a   : > { %v271_v28 = vsub.f32 %v270_v27, %v243_v26 }
 0x15c   : > { %v272_v29 = vmul.f32 1.442695, %v271_v28 }
 0x15e   : > { %553 = vpow2.f32 %v272_v29 }
 0x168   : > { %v554_v30 = vpop.eup %553 }
 0x169   : > { %v274_v31 = vsub.f32 1.0, %v554_v30 }
 0x16b   : > { %v275_v32 = vmul.f32 %v274_v31, %v274_v31 }
 0x16d   : > { %v276_v33 = vmul.f32 %v275_v32, %v271_v28 }
 0x16f   : > { %v277_v34 = vsel %vm760_vm4, %v276_v33, 0.0 }
 0x170   : > { %v280_v35 = vsel %vm279_vm8, %v277_v34, 0.0 }
 0x171   : > { %281 = vadd.xlane.f32.xlu1 %v280_v35 }
 0x1fe   : > { %v282_v40 = vpop.xlane.xlu1 %281 }
 0x1ff   : > { %v283_v41 = vrot.slane %v282_v40, 4 }
 0x201   : > { %v284_v42 = vadd.f32 %v283_v41, %v282_v40 }
 0x203   : > { %v285_v44 = vrot.slane %v284_v42, 2 }
 0x205   : > { %v286_v45 = vadd.f32 %v285_v44, %v284_v42 }
 0x207   : > { %v287_v47 = vrot.slane %v286_v45, 1 }
 0x209   : > { %v288_v48 = vadd.f32 %v287_v47, %v286_v45 }
 0x20b   : > { %468 = vpush %v288_v48 }
 0x20c   : > { %470 = vpush %v304_v49 }
 0x23b   : > { %312 = sbr.rel (%p461_p0) target bundleno = 719 (0x2cf), region = 36 }
 0x23c   : > { %s469_s24 = spop %468 }
 0x23d   : > { %v290_v52 = vstv %s469_s24  ;;  %s471_s27 = spop %470 }
 0x23e   : > { %v291_v53 = vadd.f32 %v290_v52, %v278_v50  ;;  %v306_v54 = vstv %s471_s27 }
 0x23f   : > { %v307_v55 = vadd.f32 %v306_v54, %v294_v51 }
 0x240   : > { %293 = vst.msk [vmem:[#allocation2] sm:$0x1] %vm292_vm9, %v291_v53 }
 0x241   : > { %308 = vst.msk [vmem:[#allocation3] sm:$0x1] %vm292_vm9, %v307_v55 }
 0x247   : > { %v463_v58 = vld [vmem:[#allocation2] ss:$0 sm:$0xff] }
 0x248   : > { %v462_v56 = vld [vmem:[#allocation3] ss:$0 sm:$0xff] }
 0x249   : > { %326 = vperm.xlu0 %555, %v462_v56  }
 0x24d   : > { %336 = vperm.xlu0 %555, %v463_v58  }
 0x2c8   : > { %v327_v59 = vpop.permute.xlu0 %326 }
 0x2c9   : > { %v329_v60 = vsel %vm318_vm13, %v327_v59, 0.0 }
 0x2cc   : > { %v337_v61 = vpop.permute.xlu0 %336 }
 0x2cd   : > { %v339_v62 = vsel %vm315_vm14, %v337_v61, %v329_v60 }
 0x2ce   : > { %340 = vst [vmem:[%s199_s18] sm:$0xff] %v339_v62 }
 0x2cf PF: > { %s465_s12 = sshll.u32 %s638_s13, 7  ;;  %s355_s4 = sshll.u32 %s199_s18, 4  ;;  %s356_s4 = int_to_ptr.vmem [resolvable:$true] %s355_s4 }
 0x2d0   : > { %s787_s3 = scalar_lea.hbm %s840_s2, %s465_s12  ;;  %s342_s5 = scalar_lea.sflag [#allocation5], %s197_s26 }
 0x2d1   : > { %s556_s6 = scalar_lea.vmem %s356_s4, 128  ;;  %s656_s7 = smov [#allocation4]  }
 0x2d2   : > { %p557_p1 = scmp.ne.s32.totalorder %s356_s4, %s556_s6  ;;  %s560_s8 = sshll.u32 %s656_s7, 4  ;;  %s561_s8 = int_to_ptr.vmem [resolvable:$false] %s560_s8 }
 0x2d3   : > { %s562_s17 = scalar_lea.vmem %s561_s8, 256  ;;  %p563_p5 = scmp.lt.s32.totalorder %s356_s4, %s561_s8 }
 0x2d4   : > { %p558_p2 = pnand %p557_p1, %p721_p3  ;;  %p564_p6 = scmp.lt.s32.totalorder %s562_s17, %s556_s6 }
 0x2d6   : > { %p559_p4 = pneg %p558_p2  ;;  %p565_p7 = por %p564_p6, %p563_p5 }
 0x2d8   : > { %p566_p8 = pnand %p565_p7, %p559_p4 }
 0x2da   : > { %569 = shalt.err (!%p566_p8)
}
 0x2db   : > { %s570_s13 = scalar_lea.hbm %s787_s3, 128  ;;  %s574_s18 = scalar_lea.hbm %s840_s2, 256 }
 0x2dc   : > { %p571_p10 = scmp.ne.s32.totalorder %s787_s3, %s570_s13  ;;  %p575_p13 = scmp.lt.u32.totalorder %s787_s3, %s840_s2 }
 0x2dd   : > { %p576_p0 = scmp.lt.u32.totalorder %s574_s18, %s570_s13  ;;  %p578_p2 = scmp.lt.u32.totalorder %s570_s13, %s787_s3 }
 0x2de   : > { %p572_p11 = pnand %p571_p10, %p721_p3 }
 0x2df   : > { %p577_p1 = por %p576_p0, %p575_p13 }
 0x2e0   : > { %p573_p12 = pneg %p572_p11 }
 0x2e1   : > { %p579_p4 = por %p578_p2, %p577_p1 }
 0x2e3   : > { %p580_p5 = pnand %p579_p4, %p573_p12 }
 0x2e5   : > { %583 = shalt.err (!%p580_p5)
}
 0x2e6   : > { %472 = dma.vmem_to_hbm [thread:$0]  (%p721_p3), %s356_s4, 128, %s787_s3, %s342_s5  }
 0x2e7 PF: > { %p478_p6 = scmp.ge.s32.totalorder %s650_s16, 2  ;;  %s367_s27 = sand.u32 1, %s622_s9  }
 0x2e8   : > { %s368_s12 = scalar_lea.sflag [#allocation5], %s367_s27 }
 0x2e9   : > { %p475_p7 = pnand %p478_p6, %p731_p9 }
 0x2eb   : > { %617 = dma.done.wait (!%p475_p7), %s368_s12, 128  }
 0x2ec   : > { %619 = vsyncadd (!%p475_p7), %s368_s12, 4294967168  ;;  %s15_s16 = sadd.s32 1, %s650_s16   ;;  %s845_s9 = smov %s626_s10 }
 0x2ed   : > { %p12_p8 = scmp.ge.s32.totalorder %s15_s16, 6   ;;  %s846_s10 = smov %s630_s11 }
 0x2ee   : > { %s847_s11 = smov %s739_s25  ;;  %s848_s12 = smov %s642_s14 }
 0x2ef   : > { %s849_s13 = smov %s646_s15  ;;  %s850_s14 = smov %s853_s19 }
 0x2f0   : > { %s851_s15 = smov %s857_s20  ;;  %14 = sbr.rel (!%p12_p8) target bundleno = 5 (0x5), region = 74 }
 0x2f7   :  { %373 = vsyncpa [#allocation5], 1 }
 0x2f8   :  { %375 = vsyncpa [#allocation5 + $0x1], 1 }

</bundles_post_ra>
